<compile_context>
chip_gen: v6e
topology: v6e:2x2x1
jax: 0.10.0
libtpu: 0.0.40
codegen_flags: <defaults>
</compile_context>

<pallas_src>
import functools
import math

import jax
import jax.numpy as jnp
from jax.experimental import pallas as pl
from jax.experimental.pallas import tpu as pltpu


def _round_up(x, m):
    return ((x + m - 1) // m) * m


def _pfn_kernel(x_ref, w_ref, shift_ref, o_ref, *, cm, G, ch):
    # x_ref:     (R, g*Cin)  f32, R = tm*G rows; each row packs g points
    # w_ref:     (g*Cin, L)  block-diagonal BN-scaled weight, blocks = [W|W]
    # shift_ref: (1, L)      folded BN shift, tiled per point slot
    # o_ref:     (R, L)      lane-dense output (L = g*2*ch, multiple of 128)
    R, gcin = x_ref.shape
    L = o_ref.shape[-1]
    two_ch = 2 * ch
    rows = cm * G                     # rows per inner chunk (128 for G=8,cm=16)
    n_chunks = R // rows

    # Loop invariants hoisted once (weight stays resident across the loop).
    w = w_ref[...]                    # (gcin, L)
    shift = shift_ref[...]            # (1, L)
    lane = jax.lax.broadcasted_iota(jnp.int32, (1, L), 1)
    sel = (lane % two_ch) >= ch       # True -> lane carries the per-pillar max

    def body(i, carry):
        r = pl.multiple_of(i * rows, rows)
        x = x_ref[pl.ds(r, rows), :]                              # (rows, gcin)

        # Linear with BN scale folded in; the block-diagonal weight emits the
        # packed lane layout directly: (rows, gcin) @ (gcin, L) on the MXU.
        y = jnp.dot(x, w, preferred_element_type=jnp.float32)    # (rows, L)
        y = jnp.maximum(y + shift, 0.0)                          # BN shift+ReLU

        if cm == 1:
            # One pillar per chunk (general fallback): max over its G rows,
            # then fold the g lane slots with a short XLU roll tree.
            m = jnp.max(y, axis=0, keepdims=True)                # (1, L)
            s = two_ch
            while s < L:
                m = jnp.maximum(m, pltpu.roll(m, s, axis=1))
                s *= 2
            out = jnp.where(sel, m, y)                           # (rows, L)
        else:
            # cm pillars per chunk: free sublane-aligned split (G % 8 == 0),
            # sublane reduce per pillar, lane-slot roll tree, then select.
            y3 = y.reshape(cm, G, L)
            m = jnp.max(y3, axis=1)                              # (cm, L)
            s = two_ch
            while s < L:
                m = jnp.maximum(m, pltpu.roll(m, s, axis=1))
                s *= 2
            out = jnp.where(sel, m[:, None, :], y3).reshape(rows, L)

        # Single lane-dense store; bf16 cast only here (halves output HBM).
        o_ref[pl.ds(r, rows), :] = out.astype(o_ref.dtype)
        return carry

    jax.lax.fori_loop(0, n_chunks, body, 0)


def pfn_layer(inputs, weight, bn_gamma, bn_beta, bn_mean, bn_var, *,
              eps=1e-3, tm=512, out_dtype=jnp.bfloat16):
    """inputs: (N, P, C_in) f32; weight: (C_half, C_in) (torch Linear layout)."""
    N, P, Cin = inputs.shape
    Ch = weight.shape[0]

    # Point-packing factor g: output row width g*2*Ch becomes a multiple of
    # 128 lanes and G = P/g a multiple of 8 sublanes (free in-kernel reshapes).
    g = 1
    for cand in (4, 2, 1):
        if P % cand == 0 and (P // cand) % 8 == 0:
            g = cand
            break
    G = P // g
    L = g * 2 * Ch
    gcin = g * Cin

    # ---- fold eval-mode BatchNorm into the weight (scale) + a shift ----------
    scale = (bn_gamma / jnp.sqrt(bn_var + eps)).astype(jnp.float32)      # (Ch,)
    shift = (bn_beta - bn_mean * scale).astype(jnp.float32)              # (Ch,)
    w_scaled = weight.T.astype(jnp.float32) * scale[None, :]             # (Cin, Ch)
    # Duplicate output channels so the same matmul also produces the copy that
    # will carry the per-pillar max, then block-diagonalise over g point slots.
    w2 = jnp.concatenate([w_scaled, w_scaled], axis=1)                   # (Cin, 2Ch)
    w_block = jnp.kron(jnp.eye(g, dtype=jnp.float32), w2)                # (gcin, L)
    shift2 = jnp.tile(jnp.concatenate([shift, shift]), g)[None, :]       # (1, L)

    # ---- flattened lane-dense views: free row-major reshapes, no HBM copies --
    x2d = inputs.astype(jnp.float32).reshape(N * G, gcin)

    # ---- tile sizing: no pillar padding, cdiv grid with a partial tail -------
    cm = max(1, 128 // G) if G % 8 == 0 else 1       # rows/chunk ~= 128 (MXU pass)
    row_align = 8 // math.gcd(8, G)                  # keep tile rows 8-aligned
    align = cm * row_align // math.gcd(cm, row_align)
    # Cap tm so the grid has >= ~4 steps when N permits (pipelining + both v7x
    # TensorCores); always a multiple of the chunk size.
    tm = _round_up(max(1, min(tm, pl.cdiv(N, 4))), align)
    grid_steps = pl.cdiv(N, tm)

    kernel = functools.partial(_pfn_kernel, cm=cm, G=G, ch=Ch)
    out2d = pl.pallas_call(
        kernel,
        out_shape=jax.ShapeDtypeStruct((N * G, L), out_dtype),
        grid_spec=pltpu.PrefetchScalarGridSpec(
            num_scalar_prefetch=0,
            grid=(grid_steps,),
            in_specs=[
                pl.BlockSpec((tm * G, gcin), lambda i: (i, 0)),
                pl.BlockSpec((gcin, L), lambda i: (0, 0)),
                pl.BlockSpec((1, L), lambda i: (0, 0)),
            ],
            out_specs=pl.BlockSpec((tm * G, L), lambda i: (i, 0)),
        ),
        compiler_params=pltpu.CompilerParams(
            dimension_semantics=("parallel",),
            # ~8 MiB live at tm=512 with bf16 output (in 2x2 MiB, out 2x2 MiB);
            # 32 MiB is safe on every generation incl. v7x's 64 MiB VMEM and
            # raises v5e's 16 MiB default.
            vmem_limit_bytes=32 * 1024 * 1024,
        ),
    )(x2d, w_block, shift2)

    # Restore the (N, P, 2*Ch) view (free row-major reshape, no slicing).
    return out2d.reshape(N, P, 2 * Ch)


def pfn_layer_ref(inputs, weight, bn_gamma, bn_beta, bn_mean, bn_var, *, eps=1e-3):
    x = jnp.einsum("npd,cd->npc", inputs, weight)
    x = (x - bn_mean) / jnp.sqrt(bn_var + eps) * bn_gamma + bn_beta
    x = jnp.maximum(x, 0.0)
    x_max = jnp.max(x, axis=1, keepdims=True)
    return jnp.concatenate([x, jnp.broadcast_to(x_max, x.shape)], axis=-1)


if __name__ == "__main__":
    # PFNLayer(in_channels=10, out_channels=64, use_norm=True, last_layer=False)
    #   -> internal linear out_channels = 64 // 2 = 32
    N_PILLARS, P_POINTS, C_IN, C_OUT = 100, 32, 10, 64
    C_HALF = C_OUT // 2

    key = jax.random.PRNGKey(0)
    k_x, k_w, k_g, k_b, k_m, k_v = jax.random.split(key, 6)

    inputs = jax.random.normal(k_x, (N_PILLARS, P_POINTS, C_IN), jnp.float32)
    weight = jax.random.normal(k_w, (C_HALF, C_IN), jnp.float32) * 0.1
    bn_gamma = 1.0 + 0.1 * jax.random.normal(k_g, (C_HALF,), jnp.float32)
    bn_beta = 0.1 * jax.random.normal(k_b, (C_HALF,), jnp.float32)
    bn_mean = 0.05 * jax.random.normal(k_m, (C_HALF,), jnp.float32)
    bn_var = jnp.abs(1.0 + 0.1 * jax.random.normal(k_v, (C_HALF,), jnp.float32))

    ref = pfn_layer_ref(inputs, weight, bn_gamma, bn_beta, bn_mean, bn_var)

    # Default path: bf16 output, auto-capped tile -> ~4-step grid with a
    # partial tail tile (no pillar padding / slicing).
    out = jax.block_until_ready(
        pfn_layer(inputs, weight, bn_gamma, bn_beta, bn_mean, bn_var))
    assert out.shape == (N_PILLARS, P_POINTS, C_OUT), out.shape
    assert out.dtype == jnp.bfloat16, out.dtype
    assert jnp.allclose(out.astype(jnp.float32), ref, atol=2e-2, rtol=2e-2), \
        float(jnp.max(jnp.abs(out.astype(jnp.float32) - ref)))

    # f32 output + small tile: exercises the 7-step grid (partial tail) and the
    # single-chunk inner loop, with tight tolerance on the f32 path.
    out2 = jax.block_until_ready(
        pfn_layer(inputs, weight, bn_gamma, bn_beta, bn_mean, bn_var,
                  tm=16, out_dtype=jnp.float32))
    assert jnp.allclose(out2, ref, atol=1e-3, rtol=1e-3), \
        float(jnp.max(jnp.abs(out2 - ref)))

    print("KERNEL_OK")
</pallas_src>

<mosaic_0001>
module attributes {stable_mosaic.version = 11 : i64} {
  func.func @_pfn_kernel(%arg0: i32, %arg1: memref<256x40xf32, #tpu.memory_space<vmem>>, %arg2: memref<40x256xf32, #tpu.memory_space<vmem>>, %arg3: memref<1x256xf32, #tpu.memory_space<vmem>>, %arg4: memref<256x256xbf16, #tpu.memory_space<vmem>>) attributes {dimension_semantics = [#tpu.dimension_semantics<parallel>], iteration_bounds = array<i64: 4>, scalar_prefetch = 0 : i64, scratch_operands = 0 : i64, tpu.core_type = #tpu.core_type<tc>, window_params = [{transform_indices = @transform_0, window_bounds = array<i64: 256, 40>}, {pipeline_mode = #tpu.pipeline_mode<synchronous>, transform_indices = @transform_1, window_bounds = array<i64: 40, 256>}, {pipeline_mode = #tpu.pipeline_mode<synchronous>, transform_indices = @transform_2, window_bounds = array<i64: 1, 256>}, {transform_indices = @transform_3, window_bounds = array<i64: 256, 256>}]} {
    %c0 = arith.constant 0 : index
    %c0_0 = arith.constant 0 : index
    %0 = vector.load %arg2[%c0, %c0_0] : memref<40x256xf32, #tpu.memory_space<vmem>>, vector<40x256xf32>
    %c0_1 = arith.constant 0 : index
    %c0_2 = arith.constant 0 : index
    %1 = vector.load %arg3[%c0_1, %c0_2] : memref<1x256xf32, #tpu.memory_space<vmem>>, vector<1x256xf32>
    %2 = tpu.iota {dimensions = array<i32: 1>} : vector<1x256xi32>
    %c64_i32 = arith.constant 64 : i32
    %c0_i32 = arith.constant 0 : i32
    %3 = arith.cmpi eq, %c64_i32, %c0_i32 : i32
    %c1_i32 = arith.constant 1 : i32
    %4 = arith.select %3, %c1_i32, %c64_i32 : i32
    %5 = vector.broadcast %4 : i32 to vector<1x256xi32>
    %6 = arith.remsi %2, %5 : vector<1x256xi32>
    %c0_i32_3 = arith.constant 0 : i32
    %7 = vector.broadcast %c0_i32_3 : i32 to vector<1x256xi32>
    %8 = arith.cmpi ne, %6, %7 : vector<1x256xi32>
    %c0_i32_4 = arith.constant 0 : i32
    %9 = vector.broadcast %c0_i32_4 : i32 to vector<1x256xi32>
    %10 = arith.cmpi slt, %6, %9 : vector<1x256xi32>
    %c0_i32_5 = arith.constant 0 : i32
    %11 = arith.cmpi slt, %4, %c0_i32_5 : i32
    %12 = vector.broadcast %11 : i1 to vector<1x256xi1>
    %13 = vector.broadcast %12 : vector<1x256xi1> to vector<1x256xi1>
    %14 = arith.xori %10, %13 : vector<1x256xi1>
    %15 = arith.andi %14, %8 : vector<1x256xi1>
    %16 = vector.broadcast %4 : i32 to vector<1x256xi32>
    %17 = arith.addi %6, %16 : vector<1x256xi32>
    %18 = arith.select %15, %17, %6 : vector<1x256xi1>, vector<1x256xi32>
    %c32_i32 = arith.constant 32 : i32
    %19 = vector.broadcast %c32_i32 : i32 to vector<1x256xi32>
    %20 = arith.cmpi sge, %18, %19 : vector<1x256xi32>
    %c0_i32_6 = arith.constant 0 : i32
    %c2_i32 = arith.constant 2 : i32
    %21 = arith.addi %c0_i32_6, %c2_i32 : i32
    %c1_i32_7 = arith.constant 1 : i32
    scf.for %arg5 = %c0_i32_6 to %21 step %c1_i32_7  : i32 {
      %c128_i32 = arith.constant 128 : i32
      %22 = arith.muli %arg5, %c128_i32 : i32
      %23 = tpu.assume_multiple %22, 128 : i32
      %24 = arith.index_cast %23 : i32 to index
      %c0_9 = arith.constant 0 : index
      %25 = vector.load %arg1[%24, %c0_9] : memref<256x40xf32, #tpu.memory_space<vmem>>, vector<128x40xf32>
      %cst = arith.constant dense<0.000000e+00> : vector<128x256xf32>
      %26 = tpu.matmul %25, %0, %cst {dimension_numbers = #tpu.dot_dimension_numbers<[1], [0], [0], [1], [0, 0, 1, 1], [], []>} : vector<128x40xf32>, vector<40x256xf32>, vector<128x256xf32> -> vector<128x256xf32>
      %27 = vector.broadcast %1 : vector<1x256xf32> to vector<128x256xf32>
      %28 = arith.addf %26, %27 : vector<128x256xf32>
      %cst_10 = arith.constant 0.000000e+00 : f32
      %29 = vector.broadcast %cst_10 : f32 to vector<128x256xf32>
      %30 = arith.maximumf %28, %29 : vector<128x256xf32>
      %31 = vector.shape_cast %30 : vector<128x256xf32> to vector<16x8x256xf32>
      %cst_11 = arith.constant dense<0xFF800000> : vector<16x256xf32>
      %32 = vector.multi_reduction <maximumf>, %31, %cst_11 [1] : vector<16x8x256xf32> to vector<16x256xf32>
      %c64_i32_12 = arith.constant 64 : i32
      %33 = tpu.dynamic_rotate %32 by %c64_i32_12 dim 1 : vector<16x256xf32>, i32 -> vector<16x256xf32>
      %34 = arith.maximumf %32, %33 : vector<16x256xf32>
      %c128_i32_13 = arith.constant 128 : i32
      %35 = tpu.dynamic_rotate %34 by %c128_i32_13 dim 1 : vector<16x256xf32>, i32 -> vector<16x256xf32>
      %36 = arith.maximumf %34, %35 : vector<16x256xf32>
      %37 = vector.shape_cast %36 : vector<16x256xf32> to vector<16x1x256xf32>
      %38 = vector.shape_cast %20 : vector<1x256xi1> to vector<1x1x256xi1>
      %39 = vector.broadcast %38 : vector<1x1x256xi1> to vector<16x8x256xi1>
      %40 = vector.shape_cast %37 : vector<16x1x256xf32> to vector<16x1x256xf32>
      %41 = vector.broadcast %40 : vector<16x1x256xf32> to vector<16x8x256xf32>
      %42 = arith.select %39, %41, %31 : vector<16x8x256xi1>, vector<16x8x256xf32>
      %43 = vector.shape_cast %42 : vector<16x8x256xf32> to vector<128x256xf32>
      %44 = arith.truncf %43 : vector<128x256xf32> to vector<128x256xbf16>
      %45 = arith.index_cast %23 : i32 to index
      %c0_14 = arith.constant 0 : index
      %46 = vector.load %arg4[%45, %c0_14] : memref<256x256xbf16, #tpu.memory_space<vmem>>, vector<128x256xbf16>
      tpu.vector_store %arg4[%45, %c0_14], %44 {strides = array<i32>} : memref<256x256xbf16, #tpu.memory_space<vmem>>, vector<128x256xbf16>,
    }
    %c2_i32_8 = arith.constant 2 : i32
    return
  }
  func.func @transform_0(%arg0: i32) -> (i32, i32) {
    %c0_i32 = arith.constant 0 : i32
    %c0_i32_0 = arith.constant 0 : i32
    return %arg0, %c0_i32 : i32, i32
  }
  func.func @transform_1(%arg0: i32) -> (i32, i32) {
    %c0_i32 = arith.constant 0 : i32
    %c0_i32_0 = arith.constant 0 : i32
    %c0_i32_1 = arith.constant 0 : i32
    return %c0_i32, %c0_i32_0 : i32, i32
  }
  func.func @transform_2(%arg0: i32) -> (i32, i32) {
    %c0_i32 = arith.constant 0 : i32
    %c0_i32_0 = arith.constant 0 : i32
    %c0_i32_1 = arith.constant 0 : i32
    return %c0_i32, %c0_i32_0 : i32, i32
  }
  func.func @transform_3(%arg0: i32) -> (i32, i32) {
    %c0_i32 = arith.constant 0 : i32
    %c0_i32_0 = arith.constant 0 : i32
    return %arg0, %c0_i32 : i32, i32
  }
}

</mosaic_0001>

<bundles_post_ra>
// kernel: tpu_custom_call.1
= control target key start
LH: loop header
LB: loop body
LE: loop exit
PB: predicated region body
PF: predicated region fallthrough
CT: control target
= control target key end

     0   :  { %8 = vsyncpa [#allocation3], 0  ;;  %s2724_s0 = inlined_call_operand.vmem [shape: f32[800,40], index: 0, kind: input, shape index: {}]   ;;  %s2725_s1 = inlined_call_operand.vmem [shape: f32[40,256], index: 1, kind: input, shape index: {}]   ;;  %s2726_s2 = inlined_call_operand.vmem [shape: f32[1,256], index: 2, kind: input, shape index: {}]   ;;  %s2727_s3 = inlined_call_operand.hbm [shape: bf16[800,256], index: 3, kind: output, shape index: {}]  }
   0x1   :  { %10 = vsyncpa [#allocation3 + $0x1], 0  ;;  %s1678_s12 = smov 0   ;;  %s1680_s13 = smov 0  }
   0x2   :  { %s1682_s14 = smov 0   ;;  %s1684_s15 = smov 0  }
   0x3 LB: > { %s1699_s16 = sadd.s32 4294967295, %s1647_s15   ;;  %s1440_s17 = sadd.s32 4294967294, %s1647_s15   ;;  %s1647_s15 = sphi %s1684_s15, %s2925_s15   ;;  %s1643_s14 = sphi %s1682_s14, %s2924_s14   ;;  %s1639_s13 = sphi %s1680_s13, %s2923_s13   ;;  %s1635_s12 = sphi %s1678_s12, %s2922_s12  }
   0x4   : > { %s1703_s18 = sadd.s32 1, %s1647_s15   ;;  %s91_s19 = sadd.s32 1, %s1643_s14 }
   0x5   : > { %s88_s20 = ssub.s32 %s1647_s15, %s1703_s18  ;;  %p101_p0 = scmp.ne.s32.totalorder %s1643_s14, %s1639_s13 }
   0x6   : > { %p89_p1 = scmp.eq.s32.totalorder %s88_s20, 0  ;;  %p102_p2 = scmp.eq.s32.totalorder %s1699_s16, 3 }
   0x7   : > { %p107_p3 = scmp.ne.s32.totalorder %s1639_s13, %s1635_s12  ;;  %p108_p4 = scmp.eq.s32.totalorder %s1440_s17, 3 }
   0x8   : > { %s1714_s21 = scalar_select %p89_p1, %s1643_s14, %s91_s19  }
   0x9   : > { %p1716_p5 = por %p102_p2, %p101_p0  ;;  %p1720_p6 = por %p108_p4, %p107_p3 }
   0xa   : > { %p1443_p7 = scmp.ge.s32.totalorder %s1647_s15, 1  ;;  %p149_p8 = scmp.lt.s32.totalorder %s1647_s15, 5 }
   0xc   : > { %p150_p9 = pnand %p1443_p7, %p149_p8 }
   0xe   : > { %153 = sbr.rel (%p150_p9) target bundleno = 535 (0x217), region = 32 }
  0x13   : > { %s174_s24 = sand.u32 1, %s1639_s13   ;;  %s1728_s25 = sshll.u32 %s1699_s16, 5  ;;  %v1733_v0 = vld [vmem:[%s2725_s1] sm:$0xff]  ;;  %v1738_v1 = vld [vmem:[%s2725_s1 + $0x8] sm:$0xff]  ;;  %v1743_v2 = vld [vmem:[%s2725_s1 + $0x10] sm:$0xff]  ;;  %v2728_v3 = vlaneseq  ;;  %v2807_v16 = vmov 0 }
  0x14   : > { %2795 = vst [vmem:[#allocation5_spill] sm:$0xff] %v1733_v0  ;;  %2796 = vst [vmem:[#allocation6_spill] sm:$0xff] %v1738_v1  ;;  %s1747_s5 = sshll.u32 %s174_s24, 8  ;;  %p182_p10 = scmp.lt.s32.totalorder %s1728_s25, 99  ;;  %v1753_v4 = vld [vmem:[%s2725_s1 + $0x18] sm:$0xff]  ;;  %v1758_v5 = vld [vmem:[%s2725_s1 + $0x20] sm:$0xff] }
  0x15   : > { %2797 = vst [vmem:[#allocation7_spill] sm:$0xff] %v1743_v2  ;;  %2798 = vst [vmem:[#allocation8_spill] sm:$0xff] %v1753_v4  ;;  %v1763_v6 = vld [vmem:[%s2725_s1 + $0x28] sm:$0xff]  ;;  %v1768_v7 = vld [vmem:[%s2725_s1 + $0x30] sm:$0xff]  ;;  %v1781_v10 = vand.u32 127, %v2728_v3  ;;  %v2810_v17 = vmov 0 }
  0x16   : > { %2799 = vst [vmem:[#allocation9_spill] sm:$0xff] %v1758_v5  ;;  %2800 = vst [vmem:[#allocation10_spill] sm:$0xff] %v1763_v6  ;;  %v1773_v8 = vld [vmem:[%s2725_s1 + $0x38] sm:$0xff]  ;;  %v1778_v9 = vld [vmem:[%s2725_s1 + $0x40] sm:$0xff]  ;;  %s183_s29 = scalar_select %p182_p10, %s1728_s25, 99 }
  0x17   : > { %2801 = vst [vmem:[#allocation11_spill] sm:$0xff] %v1768_v7  ;;  %2802 = vst [vmem:[#allocation12_spill] sm:$0xff] %v1773_v8  ;;  %v1787_v11 = vld [vmem:[%s2725_s1 + $0x48] sm:$0xff]  ;;  %v1792_v12 = vld [vmem:[%s2726_s2] sm:$0x3]  ;;  %v210_v13 = vadd.s32 128, %v1781_v10 }
  0x18   : > { %2803 = vst [vmem:[#allocation13_spill] sm:$0xff] %v1778_v9  ;;  %2804 = vst [vmem:[#allocation14_spill] sm:$0xff] %v1781_v10  ;;  %v215_v14 = vand.u32 63, %v1781_v10  ;;  %s1446_s8 = sshll.u32 %s183_s29, 3  ;;  %s176_s17 = scalar_lea.vmem [#allocation2], %s1747_s5 }
  0x19   : > { %2805 = vst [vmem:[#allocation15_spill] sm:$0xff] %v1787_v11  ;;  %2806 = vst [vmem:[#allocation16_spill] sm:$0xff] %v1792_v12  ;;  %s1799_s11 = scalar_lea.vmem %s2724_s0, %s1446_s8  ;;  %v222_v15 = vand.u32 63, %v210_v13  ;;  %s1810_s19 = smov 0  }
  0x1a   : > { %vm1801_vm0 = vcmp.ge.s32.totalorder %v215_v14, 32 }
  0x1b   : > { %v2808_v16 = vsel %vm1801_vm0, 4294967295, %v2807_v16  ;;  %vm1805_vm1 = vcmp.ge.s32.totalorder %v222_v15, 32 }
  0x1c   : > { %2809 = vst [vmem:[#allocation17_spill] sm:$0xff] %v2808_v16  ;;  %v2811_v17 = vsel %vm1805_vm1, 4294967295, %v2810_v17 }
  0x1d   : > { %2812 = vst [vmem:[#allocation18_spill] sm:$0xff] %v2811_v17 }
  0x1e LB: >> { %v2816_v8 = vld [vmem:[#allocation12_spill] sm:$0xff]  ;;  %v2817_v7 = vld [vmem:[#allocation11_spill] sm:$0xff]  ;;  %v2818_v6 = vld [vmem:[#allocation10_spill] sm:$0xff]  ;;  %s1447_s20 = sshll.u32 %s1651_s19, 7  ;;  %vm272_vm2 = vcmask 326656   ;;  %v1653_v20 = vmov 0.0   ;;  %v2824_v3 = vlaneseq  ;;  %s1651_s19 = sphi %s1810_s19, %s242_s19  }
  0x1f   : >> { %v2815_v9 = vld [vmem:[#allocation13_spill] sm:$0xff]  ;;  %v2820_v4 = vld [vmem:[#allocation8_spill] sm:$0xff]  ;;  %v2821_v2 = vld [vmem:[#allocation7_spill] sm:$0xff]  ;;  %s1831_s26 = scalar_lea.vmem %s1799_s11, %s1447_s20  ;;  %385 = vmatprep.mubr.f32.mxu0 %v1653_v20  ;;  %433 = vmatprep.mubr.f32.mxu1 %v1653_v20  ;;  %vm738_vm3 = vcmask 1041409   ;;  %vm740_vm4 = vcmask 1042434   ;;  %vm742_vm5 = vcmask 1043459   ;;  %s2628_s28 = scalar_lea.vmem %s176_s17, %s1447_s20 [#allocation2] }
  0x20   : >> { %v2813_v12 = vld [vmem:[#allocation16_spill] sm:$0xff]  ;;  %v2814_v11 = vld [vmem:[#allocation15_spill] sm:$0xff]  ;;  %v2819_v5 = vld [vmem:[#allocation9_spill] sm:$0xff]  ;;  %v263_v35 = vshrl.u32 %v2824_v3, 7  ;;  %vm744_vm6 = vcmask 1044484   ;;  %vm746_vm7 = vcmask 1045509  }
  0x21   : >> { %v2822_v1 = vld [vmem:[#allocation6_spill] sm:$0xff]  ;;  %v2823_v0 = vld [vmem:[#allocation5_spill] sm:$0xff]  ;;  %343 = vmatprep.subr.mxu0 %v2814_v11  ;;  %1513 = vmatprep.subr.mxu1 %v2814_v11  ;;  %v247_v23 = vld [vmem:[%s1831_s26 + $0x10] sm:$0xff]  ;;  %vm748_vm8 = vcmask 1046534   ;;  %vm750_vm9 = vcmask 1047559   ;;  %s1654_s27 = smov 64  }
  0x22   : >> { %344 = vmatpush1.msra.mxu0 %v2815_v9  ;;  %1518 = vmatpush1.msra.mxu1 %v2815_v9  ;;  %v245_v18 = vld [vmem:[%s1831_s26] sm:$0xff]  ;;  %v246_v21 = vld [vmem:[%s1831_s26 + $0x8] sm:$0xff]  ;;  %v255_v24 = vld [vmem:[%s1831_s26 + $0x50] sm:$0xff]  ;;  %v1874_v36 = vsub.s32 0, %v263_v35  ;;  %v268_v37 = vsub.s32 1, %v263_v35  ;;  %s242_s19 = sadd.s32 1, %s1651_s19  }
  0x23   : >> { %345 = vmatprep.subr.mxu0 %v2816_v8  ;;  %1514 = vmatprep.subr.mxu1 %v2816_v8  ;;  %v253_v19 = vld [vmem:[%s1831_s26 + $0x40] sm:$0xff]  ;;  %v254_v22 = vld [vmem:[%s1831_s26 + $0x48] sm:$0xff]  ;;  %v248_v25 = vld [vmem:[%s1831_s26 + $0x18] sm:$0xff]  ;;  %p239_p11 = scmp.ge.s32.totalorder %s242_s19, 2  }
  0x24   : >> { %346 = vmatpush1.msra.mxu0 %v2817_v7  ;;  %1519 = vmatpush1.msra.mxu1 %v2817_v7  ;;  %v256_v26 = vld [vmem:[%s1831_s26 + $0x58] sm:$0xff]  ;;  %v249_v27 = vld [vmem:[%s1831_s26 + $0x20] sm:$0xff]  ;;  %v250_v29 = vld [vmem:[%s1831_s26 + $0x28] sm:$0xff]  ;;  %2825 = vst [vmem:[#allocation19_spill] sm:$0xff] %v1874_v36  ;;  %v1878_v38 = vrot.slane %v2813_v12, %v1874_v36  ;;  %v1881_v39 = vrot.slane %v2813_v12, %v268_v37  ;;  %s2663_s29 = scalar_lea.sflag (%p239_p11), [#allocation3], %s174_s24 }
  0x25   : >> { %347 = vmatprep.subr.mxu0 %v2818_v6  ;;  %1515 = vmatprep.subr.mxu1 %v2818_v6  ;;  %v257_v28 = vld [vmem:[%s1831_s26 + $0x60] sm:$0xff]  ;;  %v258_v30 = vld [vmem:[%s1831_s26 + $0x68] sm:$0xff]  ;;  %v251_v31 = vld [vmem:[%s1831_s26 + $0x30] sm:$0xff] }
  0x26   : >> { %348 = vmatpush1.msra.mxu0 %v2819_v5  ;;  %1520 = vmatpush1.msra.mxu1 %v2819_v5  ;;  %v259_v32 = vld [vmem:[%s1831_s26 + $0x70] sm:$0xff]  ;;  %v252_v33 = vld [vmem:[%s1831_s26 + $0x38] sm:$0xff]  ;;  %v2865_v10 = vld [vmem:[#allocation14_spill] sm:$0xff] }
  0x27   : >> { %349 = vmatprep.subr.mxu0 %v2820_v4  ;;  %1516 = vmatprep.subr.mxu1 %v2820_v4  ;;  %v260_v34 = vld [vmem:[%s1831_s26 + $0x78] sm:$0xff]  ;;  %vm785_vm10 = vcmp.lt.s32.totalorder %v2865_v10, 64 }
  0x28   : >> { %350 = vmatpush1.msra.mxu0 %v2821_v2  ;;  %1521 = vmatpush1.msra.mxu1 %v2821_v2 }
  0x29   : >> { %351 = vmatprep.subr.mxu0 %v2822_v1  ;;  %1517 = vmatprep.subr.mxu1 %v2822_v1 }
  0x2a   : >> { %352 = vmatpush1.msra.mxu0 %v2823_v0  ;;  %1522 = vmatpush1.msra.mxu1 %v2823_v0 }
  0x2b   : >> { %1448 = vmatmul.mubr.msk.f32.vlgmr.msra.gmra.mxu0 %vm272_vm2, %v245_v18  ;;  %1456 = vmatmul.mubr.msk.f32.vlgmr.msra.gmra.mxu1 %vm272_vm2, %v253_v19 }
  0x2c   : >> { %391 = vmatprep.mubr.f32.mxu0 %v1653_v20  ;;  %439 = vmatprep.mubr.f32.mxu1 %v1653_v20 }
  0x2f   : >> { %1449 = vmatmul.mubr.msk.f32.gmra.mxu0 %vm272_vm2, %v246_v21  ;;  %1457 = vmatmul.mubr.msk.f32.gmra.mxu1 %vm272_vm2, %v254_v22 }
  0x30   : >> { %397 = vmatprep.mubr.f32.mxu0 %v1653_v20  ;;  %445 = vmatprep.mubr.f32.mxu1 %v1653_v20 }
  0x33   : >> { %1450 = vmatmul.mubr.msk.f32.gmra.mxu0 %vm272_vm2, %v247_v23  ;;  %1458 = vmatmul.mubr.msk.f32.gmra.mxu1 %vm272_vm2, %v255_v24 }
  0x34   : >> { %403 = vmatprep.mubr.f32.mxu0 %v1653_v20  ;;  %451 = vmatprep.mubr.f32.mxu1 %v1653_v20 }
  0x37   : >> { %1451 = vmatmul.mubr.msk.f32.gmra.mxu0 %vm272_vm2, %v248_v25  ;;  %1459 = vmatmul.mubr.msk.f32.gmra.mxu1 %vm272_vm2, %v256_v26 }
  0x38   : >> { %409 = vmatprep.mubr.f32.mxu0 %v1653_v20  ;;  %457 = vmatprep.mubr.f32.mxu1 %v1653_v20 }
  0x3b   : >> { %1452 = vmatmul.mubr.msk.f32.gmra.mxu0 %vm272_vm2, %v249_v27  ;;  %1460 = vmatmul.mubr.msk.f32.gmra.mxu1 %vm272_vm2, %v257_v28 }
  0x3c   : >> { %415 = vmatprep.mubr.f32.mxu0 %v1653_v20  ;;  %463 = vmatprep.mubr.f32.mxu1 %v1653_v20 }
  0x3f   : >> { %1453 = vmatmul.mubr.msk.f32.gmra.mxu0 %vm272_vm2, %v250_v29  ;;  %1461 = vmatmul.mubr.msk.f32.gmra.mxu1 %vm272_vm2, %v258_v30 }
  0x40   : >> { %421 = vmatprep.mubr.f32.mxu0 %v1653_v20  ;;  %469 = vmatprep.mubr.f32.mxu1 %v1653_v20 }
  0x43   : >> { %1454 = vmatmul.mubr.msk.f32.gmra.mxu0 %vm272_vm2, %v251_v31  ;;  %1462 = vmatmul.mubr.msk.f32.gmra.mxu1 %vm272_vm2, %v259_v32 }
  0x44   : >> { %427 = vmatprep.mubr.f32.mxu0 %v1653_v20  ;;  %475 = vmatprep.mubr.f32.mxu1 %v1653_v20 }
  0x47   : >> { %1455 = vmatmul.mubr.msk.f32.gmra.mxu0 %vm272_vm2, %v252_v33  ;;  %1463 = vmatmul.mubr.msk.f32.gmra.mxu1 %vm272_vm2, %v260_v34 }
  0xeb   : >> { %v387_v40 = vpop.f32.mrf.mxu0  ;;  %v435_v41 = vpop.f32.mrf.mxu1 }
  0xec   : >> { %v388_v42 = vadd.f32 %v387_v40, %v1878_v38  ;;  %v436_v43 = vadd.f32 %v435_v41, %v1878_v38 }
  0xed   : >> { %v389_v44 = vpop.f32.mrf.mxu0  ;;  %v437_v45 = vpop.f32.mrf.mxu1 }
  0xee   : >> { %v1885_v46 = vmax.f32 %v388_v42, 0.0  ;;  %v1887_v47 = vmax.f32 %v436_v43, 0.0  ;;  %v390_v48 = vadd.f32 %v389_v44, %v1881_v39  ;;  %v438_v49 = vadd.f32 %v437_v45, %v1881_v39 }
  0xef   : >> { %v393_v50 = vpop.f32.mrf.mxu0  ;;  %v441_v51 = vpop.f32.mrf.mxu1 }
  0xf0   : >> { %2826 = vst [vmem:[#allocation20_spill] sm:$0xff] %v1885_v46  ;;  %2827 = vst [vmem:[#allocation21_spill] sm:$0xff] %v1887_v47  ;;  %v514_v52 = vrot.slane %v1885_v46, 4  ;;  %v610_v53 = vrot.slane %v1887_v47, 4  ;;  %v1893_v54 = vmax.f32 %v390_v48, 0.0  ;;  %v1895_v55 = vmax.f32 %v438_v49, 0.0 }
  0xf1   : >> { %v394_v56 = vadd.f32 %v393_v50, %v1878_v38  ;;  %v442_v57 = vadd.f32 %v441_v51, %v1878_v38  ;;  %v395_v58 = vpop.f32.mrf.mxu0  ;;  %v443_v59 = vpop.f32.mrf.mxu1 }
  0xf2   : >> { %2828 = vst [vmem:[#allocation22_spill] sm:$0xff] %v1893_v54  ;;  %2829 = vst [vmem:[#allocation23_spill] sm:$0xff] %v1895_v55  ;;  %v515_v60 = vmax.f32 %v1885_v46, %v514_v52  ;;  %v611_v61 = vmax.f32 %v1887_v47, %v610_v53  ;;  %v520_v62 = vrot.slane %v1893_v54, 4  ;;  %v616_v63 = vrot.slane %v1895_v55, 4 }
  0xf3   : >> { %v1903_v13 = vmax.f32 %v394_v56, 0.0  ;;  %v1905_v14 = vmax.f32 %v442_v57, 0.0  ;;  %v396_v15 = vadd.f32 %v395_v58, %v1881_v39  ;;  %v444_v18 = vadd.f32 %v443_v59, %v1881_v39  ;;  %v399_v31 = vpop.f32.mrf.mxu0  ;;  %v447_v32 = vpop.f32.mrf.mxu1 }
  0xf4   : >> { %v516_v19 = vrot.slane %v515_v60, 2  ;;  %v612_v20 = vrot.slane %v611_v61, 2  ;;  %v521_v21 = vmax.f32 %v1893_v54, %v520_v62  ;;  %v617_v22 = vmax.f32 %v1895_v55, %v616_v63 }
  0xf5   : >> { %2830 = vst [vmem:[#allocation24_spill] sm:$0xff] %v1903_v13  ;;  %2831 = vst [vmem:[#allocation25_spill] sm:$0xff] %v1905_v14  ;;  %v526_v23 = vrot.slane %v1903_v13, 4  ;;  %v622_v24 = vrot.slane %v1905_v14, 4  ;;  %v1913_v25 = vmax.f32 %v396_v15, 0.0  ;;  %v1915_v26 = vmax.f32 %v444_v18, 0.0  ;;  %v401_v56 = vpop.f32.mrf.mxu0  ;;  %v449_v57 = vpop.f32.mrf.mxu1 }
  0xf6   : >> { %v517_v27 = vmax.f32 %v515_v60, %v516_v19  ;;  %v613_v28 = vmax.f32 %v611_v61, %v612_v20  ;;  %v522_v29 = vrot.slane %v521_v21, 2  ;;  %v618_v30 = vrot.slane %v617_v22, 2 }
  0xf7   : >> { %2832 = vst [vmem:[#allocation26_spill] sm:$0xff] %v1913_v25  ;;  %2833 = vst [vmem:[#allocation27_spill] sm:$0xff] %v1915_v26  ;;  %v527_v33 = vmax.f32 %v1903_v13, %v526_v23  ;;  %v623_v34 = vmax.f32 %v1905_v14, %v622_v24  ;;  %v532_v35 = vrot.slane %v1913_v25, 4  ;;  %v628_v37 = vrot.slane %v1915_v26, 4 }
  0xf8   : >> { %v518_v40 = vrot.slane %v517_v27, 1  ;;  %v614_v41 = vrot.slane %v613_v28, 1  ;;  %v523_v42 = vmax.f32 %v521_v21, %v522_v29  ;;  %v619_v43 = vmax.f32 %v617_v22, %v618_v30  ;;  %v405_v29 = vpop.f32.mrf.mxu0  ;;  %v453_v30 = vpop.f32.mrf.mxu1 }
  0xf9   : >> { %v528_v44 = vrot.slane %v527_v33, 2  ;;  %v624_v45 = vrot.slane %v623_v34, 2  ;;  %v533_v48 = vmax.f32 %v1913_v25, %v532_v35  ;;  %v629_v49 = vmax.f32 %v1915_v26, %v628_v37 }
  0xfa   : >> { %v1923_v50 = vmax.f32 %v517_v27, %v518_v40  ;;  %v1925_v51 = vmax.f32 %v613_v28, %v614_v41  ;;  %v524_v52 = vrot.slane %v523_v42, 1  ;;  %v620_v53 = vrot.slane %v619_v43, 1 }
  0xfb   : >> { %v529_v58 = vmax.f32 %v527_v33, %v528_v44  ;;  %v625_v59 = vmax.f32 %v623_v34, %v624_v45  ;;  %v534_v60 = vrot.slane %v533_v48, 2  ;;  %v630_v61 = vrot.slane %v629_v49, 2 }
  0xfc   : >> { %v1927_v62 = vmax.f32 %v523_v42, %v524_v52  ;;  %v1929_v63 = vmax.f32 %v619_v43, %v620_v53  ;;  %v400_v15 = vadd.f32 %v399_v31, %v1878_v38  ;;  %v448_v18 = vadd.f32 %v447_v32, %v1878_v38 }
  0xfd   : >> { %v530_v19 = vrot.slane %v529_v58, 1  ;;  %v626_v20 = vrot.slane %v625_v59, 1  ;;  %v535_v21 = vmax.f32 %v533_v48, %v534_v60  ;;  %v631_v22 = vmax.f32 %v629_v49, %v630_v61 }
  0xfe   : >> { %v1933_v23 = vmax.f32 %v400_v15, 0.0  ;;  %v1935_v24 = vmax.f32 %v448_v18, 0.0  ;;  %v402_v27 = vadd.f32 %v401_v56, %v1881_v39  ;;  %v450_v28 = vadd.f32 %v449_v57, %v1881_v39  ;;  %v407_v56 = vpop.f32.mrf.mxu0  ;;  %v455_v57 = vpop.f32.mrf.mxu1 }
  0xff   : >> { %v1939_v33 = vmax.f32 %v529_v58, %v530_v19  ;;  %v1941_v34 = vmax.f32 %v625_v59, %v626_v20  ;;  %v536_v31 = vrot.slane %v535_v21, 1  ;;  %v632_v32 = vrot.slane %v631_v22, 1 }
 0x100   : >> { %2834 = vst [vmem:[#allocation28_spill] sm:$0xff] %v1933_v23  ;;  %2835 = vst [vmem:[#allocation29_spill] sm:$0xff] %v1935_v24  ;;  %v538_v35 = vrot.slane %v1933_v23, 4  ;;  %v634_v37 = vrot.slane %v1935_v24, 4  ;;  %v1945_v40 = vmax.f32 %v402_v27, 0.0  ;;  %v1947_v41 = vmax.f32 %v450_v28, 0.0 }
 0x101   : >> { %v1952_v42 = vsel %vm738_vm3, %v1939_v33, %v1923_v50  ;;  %v1957_v43 = vsel %vm738_vm3, %v1941_v34, %v1925_v51  ;;  %v1959_v44 = vmax.f32 %v535_v21, %v536_v31  ;;  %v1961_v45 = vmax.f32 %v631_v22, %v632_v32 }
 0x102   : >> { %2836 = vst [vmem:[#allocation30_spill] sm:$0xff] %v1945_v40  ;;  %2837 = vst [vmem:[#allocation31_spill] sm:$0xff] %v1947_v41  ;;  %v539_v48 = vmax.f32 %v1933_v23, %v538_v35  ;;  %v635_v49 = vmax.f32 %v1935_v24, %v634_v37  ;;  %v544_v52 = vrot.slane %v1945_v40, 4  ;;  %v640_v53 = vrot.slane %v1947_v41, 4  ;;  %v459_v37 = vpop.f32.mrf.mxu1 }
 0x103   : >> { %v752_v58 = vsel %vm738_vm3, %v1959_v44, %v1927_v62  ;;  %v766_v59 = vsel %vm738_vm3, %v1961_v45, %v1929_v63  ;;  %v406_v60 = vadd.f32 %v405_v29, %v1878_v38  ;;  %v454_v61 = vadd.f32 %v453_v30, %v1878_v38  ;;  %v411_v30 = vpop.f32.mrf.mxu0 }
 0x104   : >> { %v540_v15 = vrot.slane %v539_v48, 2  ;;  %v636_v18 = vrot.slane %v635_v49, 2  ;;  %v545_v19 = vmax.f32 %v1945_v40, %v544_v52  ;;  %v641_v20 = vmax.f32 %v1947_v41, %v640_v53  ;;  %v461_v5 = vpop.f32.mrf.mxu1 }
 0x105   : >> { %v1977_v21 = vmax.f32 %v406_v60, 0.0  ;;  %v1979_v22 = vmax.f32 %v454_v61, 0.0  ;;  %v408_v27 = vadd.f32 %v407_v56, %v1881_v39  ;;  %v456_v28 = vadd.f32 %v455_v57, %v1881_v39 }
 0x106   : >> { %v541_v31 = vmax.f32 %v539_v48, %v540_v15  ;;  %v637_v32 = vmax.f32 %v635_v49, %v636_v18  ;;  %v546_v29 = vrot.slane %v545_v19, 2  ;;  %v642_v35 = vrot.slane %v641_v20, 2 }
 0x107   : >> { %2838 = vst [vmem:[#allocation32_spill] sm:$0xff] %v1977_v21  ;;  %2839 = vst [vmem:[#allocation33_spill] sm:$0xff] %v1979_v22  ;;  %v550_v3 = vrot.slane %v1977_v21, 4  ;;  %v646_v52 = vrot.slane %v1979_v22, 4  ;;  %v1985_v53 = vmax.f32 %v408_v27, 0.0  ;;  %v1987_v60 = vmax.f32 %v456_v28, 0.0  ;;  %v413_v28 = vpop.f32.mrf.mxu0 }
 0x108   : >> { %v542_v61 = vrot.slane %v541_v31, 1  ;;  %v638_v0 = vrot.slane %v637_v32, 1  ;;  %v547_v1 = vmax.f32 %v545_v19, %v546_v29  ;;  %v643_v56 = vmax.f32 %v641_v20, %v642_v35 }
 0x109   : >> { %2840 = vst [vmem:[#allocation34_spill] sm:$0xff] %v1985_v53  ;;  %2841 = vst [vmem:[#allocation35_spill] sm:$0xff] %v1987_v60  ;;  %v551_v57 = vmax.f32 %v1977_v21, %v550_v3  ;;  %v647_v48 = vmax.f32 %v1979_v22, %v646_v52  ;;  %v556_v49 = vrot.slane %v1985_v53, 4  ;;  %v652_v15 = vrot.slane %v1987_v60, 4 }
 0x10a   : >> { %v1993_v18 = vmax.f32 %v541_v31, %v542_v61  ;;  %v1995_v2 = vmax.f32 %v637_v32, %v638_v0  ;;  %v548_v27 = vrot.slane %v547_v1, 1  ;;  %v644_v4 = vrot.slane %v643_v56, 1 }
 0x10b   : >> { %v552_v6 = vrot.slane %v551_v57, 2  ;;  %v648_v7 = vrot.slane %v647_v48, 2  ;;  %v557_v19 = vmax.f32 %v1985_v53, %v556_v49  ;;  %v653_v3 = vmax.f32 %v1987_v60, %v652_v15 }
 0x10c   : >> { %v1999_v20 = vmax.f32 %v547_v1, %v548_v27  ;;  %v2001_v29 = vmax.f32 %v643_v56, %v644_v4  ;;  %v412_v35 = vadd.f32 %v411_v30, %v1878_v38  ;;  %v460_v31 = vadd.f32 %v459_v37, %v1878_v38  ;;  %v417_v56 = vpop.f32.mrf.mxu0  ;;  %v465_v30 = vpop.f32.mrf.mxu1 }
 0x10d   : >> { %v553_v0 = vmax.f32 %v551_v57, %v552_v6  ;;  %v649_v32 = vmax.f32 %v647_v48, %v648_v7  ;;  %v558_v52 = vrot.slane %v557_v19, 2  ;;  %v654_v61 = vrot.slane %v653_v3, 2 }
 0x10e   : >> { %v2007_v8 = vsel %vm740_vm4, %v1999_v20, %v752_v58  ;;  %v2011_v49 = vsel %vm740_vm4, %v2001_v29, %v766_v59  ;;  %v2013_v1 = vmax.f32 %v412_v35, 0.0  ;;  %v2015_v4 = vmax.f32 %v460_v31, 0.0 }
 0x10f   : >> { %v554_v15 = vrot.slane %v553_v0, 1  ;;  %v650_v37 = vrot.slane %v649_v32, 1  ;;  %v559_v6 = vmax.f32 %v557_v19, %v558_v52  ;;  %v655_v7 = vmax.f32 %v653_v3, %v654_v61  ;;  %v419_v52 = vpop.f32.mrf.mxu0  ;;  %v467_v61 = vpop.f32.mrf.mxu1 }
 0x110   : >> { %2842 = vst [vmem:[#allocation36_spill] sm:$0xff] %v2013_v1  ;;  %2843 = vst [vmem:[#allocation37_spill] sm:$0xff] %v2015_v4  ;;  %v562_v57 = vrot.slane %v2013_v1, 4  ;;  %v658_v48 = vrot.slane %v2015_v4, 4  ;;  %v414_v58 = vadd.f32 %v413_v28, %v1881_v39  ;;  %v462_v27 = vadd.f32 %v461_v5, %v1881_v39 }
 0x111   : >> { %v2021_v59 = vmax.f32 %v553_v0, %v554_v15  ;;  %v2023_v35 = vmax.f32 %v649_v32, %v650_v37  ;;  %v560_v31 = vrot.slane %v559_v6, 1  ;;  %v656_v9 = vrot.slane %v655_v7, 1 }
 0x112   : >> { %v563_v11 = vmax.f32 %v2013_v1, %v562_v57  ;;  %v659_v12 = vmax.f32 %v2015_v4, %v658_v48  ;;  %v2027_v19 = vmax.f32 %v414_v58, 0.0  ;;  %v2029_v3 = vmax.f32 %v462_v27, 0.0  ;;  %v471_v4 = vpop.f32.mrf.mxu1 }
 0x113   : >> { %v2031_v60 = vmax.f32 %v559_v6, %v560_v31  ;;  %v2033_v28 = vmax.f32 %v655_v7, %v656_v9  ;;  %v418_v5 = vadd.f32 %v417_v56, %v1878_v38  ;;  %v466_v0 = vadd.f32 %v465_v30, %v1878_v38  ;;  %v423_v31 = vpop.f32.mrf.mxu0 }
 0x114   : >> { %2844 = vst [vmem:[#allocation38_spill] sm:$0xff] %v2027_v19  ;;  %2845 = vst [vmem:[#allocation39_spill] sm:$0xff] %v2029_v3  ;;  %v564_v32 = vrot.slane %v563_v11, 2  ;;  %v660_v15 = vrot.slane %v659_v12, 2  ;;  %v568_v37 = vrot.slane %v2027_v19, 4  ;;  %v664_v57 = vrot.slane %v2029_v3, 4  ;;  %v473_v14 = vpop.f32.mrf.mxu1 }
 0x115   : >> { %v2039_v48 = vmax.f32 %v418_v5, 0.0  ;;  %v2041_v58 = vmax.f32 %v466_v0, 0.0  ;;  %v420_v27 = vadd.f32 %v419_v52, %v1881_v39  ;;  %v468_v6 = vadd.f32 %v467_v61, %v1881_v39 }
 0x116   : >> { %v565_v9 = vmax.f32 %v563_v11, %v564_v32  ;;  %v661_v7 = vmax.f32 %v659_v12, %v660_v15  ;;  %v569_v56 = vmax.f32 %v2027_v19, %v568_v37  ;;  %v665_v30 = vmax.f32 %v2029_v3, %v664_v57 }
 0x117   : >> { %2846 = vst [vmem:[#allocation40_spill] sm:$0xff] %v2039_v48  ;;  %2847 = vst [vmem:[#allocation41_spill] sm:$0xff] %v2041_v58  ;;  %v574_v22 = vrot.slane %v2039_v48, 4  ;;  %v670_v41 = vrot.slane %v2041_v58, 4  ;;  %v2049_v5 = vmax.f32 %v420_v27, 0.0  ;;  %v2051_v0 = vmax.f32 %v468_v6, 0.0  ;;  %v425_v6 = vpop.f32.mrf.mxu0 }
 0x118   : >> { %v566_v24 = vrot.slane %v565_v9, 1  ;;  %v662_v52 = vrot.slane %v661_v7, 1  ;;  %v570_v26 = vrot.slane %v569_v56, 2  ;;  %v666_v61 = vrot.slane %v665_v30, 2 }
 0x119   : >> { %2848 = vst [vmem:[#allocation42_spill] sm:$0xff] %v2049_v5  ;;  %2849 = vst [vmem:[#allocation43_spill] sm:$0xff] %v2051_v0  ;;  %v575_v11 = vmax.f32 %v2039_v48, %v574_v22  ;;  %v671_v12 = vmax.f32 %v2041_v58, %v670_v41  ;;  %v580_v32 = vrot.slane %v2049_v5, 4  ;;  %v676_v15 = vrot.slane %v2051_v0, 4 }
 0x11a   : >> { %v2057_v37 = vmax.f32 %v565_v9, %v566_v24  ;;  %v2059_v57 = vmax.f32 %v661_v7, %v662_v52  ;;  %v571_v27 = vmax.f32 %v569_v56, %v570_v26  ;;  %v667_v3 = vmax.f32 %v665_v30, %v666_v61 }
 0x11b   : >> { %v576_v55 = vrot.slane %v575_v11, 2  ;;  %v672_v47 = vrot.slane %v671_v12, 2  ;;  %v581_v19 = vmax.f32 %v2049_v5, %v580_v32  ;;  %v677_v22 = vmax.f32 %v2051_v0, %v676_v15  ;;  %v429_v32 = vpop.f32.mrf.mxu0  ;;  %v477_v15 = vpop.f32.mrf.mxu1 }
 0x11c   : >> { %v572_v48 = vrot.slane %v571_v27, 1  ;;  %v668_v41 = vrot.slane %v667_v3, 1  ;;  %v424_v58 = vadd.f32 %v423_v31, %v1878_v38  ;;  %v472_v1 = vadd.f32 %v471_v4, %v1878_v38 }
 0x11d   : >> { %v577_v24 = vmax.f32 %v575_v11, %v576_v55  ;;  %v673_v9 = vmax.f32 %v671_v12, %v672_v47  ;;  %v582_v7 = vrot.slane %v581_v19, 2  ;;  %v678_v52 = vrot.slane %v677_v22, 2 }
 0x11e   : >> { %v2065_v26 = vmax.f32 %v571_v27, %v572_v48  ;;  %v2067_v56 = vmax.f32 %v667_v3, %v668_v41  ;;  %v2069_v30 = vmax.f32 %v424_v58, 0.0  ;;  %v2071_v61 = vmax.f32 %v472_v1, 0.0  ;;  %v431_v41 = vpop.f32.mrf.mxu0 }
 0x11f   : >> { %v578_v0 = vrot.slane %v577_v24, 1  ;;  %v674_v5 = vrot.slane %v673_v9, 1  ;;  %v583_v53 = vmax.f32 %v581_v19, %v582_v7  ;;  %v679_v31 = vmax.f32 %v677_v22, %v678_v52  ;;  %v479_v7 = vpop.f32.mrf.mxu1 }
 0x120   : >> { %2850 = vst [vmem:[#allocation44_spill] sm:$0xff] %v2067_v56  ;;  %2851 = vst [vmem:[#allocation45_spill] sm:$0xff] %v2069_v30  ;;  %v586_v4 = vrot.slane %v2069_v30, 4  ;;  %v682_v47 = vrot.slane %v2071_v61, 4  ;;  %v426_v55 = vadd.f32 %v425_v6, %v1881_v39  ;;  %v474_v48 = vadd.f32 %v473_v14, %v1881_v39 }
 0x121   : >> { %2852 = vst [vmem:[#allocation46_spill] sm:$0xff] %v2071_v61  ;;  %v2077_v3 = vmax.f32 %v577_v24, %v578_v0  ;;  %v2079_v58 = vmax.f32 %v673_v9, %v674_v5  ;;  %v584_v1 = vrot.slane %v583_v53, 1  ;;  %v680_v11 = vrot.slane %v679_v31, 1 }
 0x122   : >> { %v587_v12 = vmax.f32 %v2069_v30, %v586_v4  ;;  %v683_v27 = vmax.f32 %v2071_v61, %v682_v47  ;;  %v2083_v19 = vmax.f32 %v426_v55, 0.0  ;;  %v2085_v22 = vmax.f32 %v474_v48, 0.0 }
 0x123   : >> { %2853 = vst [vmem:[#allocation47_spill] sm:$0xff] %v2079_v58  ;;  %v2087_v52 = vmax.f32 %v583_v53, %v584_v1  ;;  %v2089_v6 = vmax.f32 %v679_v31, %v680_v11  ;;  %v430_v14 = vadd.f32 %v429_v32, %v1878_v38  ;;  %v478_v5 = vadd.f32 %v477_v15, %v1878_v38 }
 0x124   : >> { %2854 = vst [vmem:[#allocation48_spill] sm:$0xff] %v2083_v19  ;;  %2855 = vst [vmem:[#allocation49_spill] sm:$0xff] %v2085_v22  ;;  %v588_v0 = vrot.slane %v587_v12, 2  ;;  %v684_v24 = vrot.slane %v683_v27, 2  ;;  %v592_v9 = vrot.slane %v2083_v19, 4  ;;  %v688_v4 = vrot.slane %v2085_v22, 4 }
 0x125   : >> { %2856 = vst [vmem:[#allocation50_spill] sm:$0xff] %v2089_v6  ;;  %v2095_v47 = vmax.f32 %v430_v14, 0.0  ;;  %v2097_v55 = vmax.f32 %v478_v5, 0.0  ;;  %v432_v53 = vadd.f32 %v431_v41, %v1881_v39  ;;  %v480_v31 = vadd.f32 %v479_v7, %v1881_v39 }
 0x126   : >> { %v589_v48 = vmax.f32 %v587_v12, %v588_v0  ;;  %v685_v32 = vmax.f32 %v683_v27, %v684_v24  ;;  %v593_v38 = vmax.f32 %v2083_v19, %v592_v9  ;;  %v689_v15 = vmax.f32 %v2085_v22, %v688_v4 }
 0x127   : >> { %2857 = vst [vmem:[#allocation51_spill] sm:$0xff] %v2095_v47  ;;  %2858 = vst [vmem:[#allocation52_spill] sm:$0xff] %v2097_v55  ;;  %v598_v1 = vrot.slane %v2095_v47, 4  ;;  %v694_v11 = vrot.slane %v2097_v55, 4  ;;  %v2105_v61 = vmax.f32 %v432_v53, 0.0  ;;  %v2107_v14 = vmax.f32 %v480_v31, 0.0 }
 0x128   : >> { %v590_v5 = vrot.slane %v589_v48, 1  ;;  %v686_v41 = vrot.slane %v685_v32, 1  ;;  %v594_v30 = vrot.slane %v593_v38, 2  ;;  %v690_v39 = vrot.slane %v689_v15, 2 }
 0x129   : >> { %2859 = vst [vmem:[#allocation53_spill] sm:$0xff] %v2105_v61  ;;  %2860 = vst [vmem:[#allocation54_spill] sm:$0xff] %v2107_v14  ;;  %v599_v12 = vmax.f32 %v2095_v47, %v598_v1  ;;  %v695_v27 = vmax.f32 %v2097_v55, %v694_v11  ;;  %v604_v7 = vrot.slane %v2105_v61, 4  ;;  %v700_v0 = vrot.slane %v2107_v14, 4 }
 0x12a   : >> { %v595_v24 = vmax.f32 %v593_v38, %v594_v30  ;;  %v691_v9 = vmax.f32 %v689_v15, %v690_v39  ;;  %v2113_v4 = vmax.f32 %v589_v48, %v590_v5  ;;  %v2115_v53 = vmax.f32 %v685_v32, %v686_v41 }
 0x12b   : >> { %v600_v31 = vrot.slane %v599_v12, 2  ;;  %v696_v22 = vrot.slane %v695_v27, 2  ;;  %v605_v19 = vmax.f32 %v2105_v61, %v604_v7  ;;  %v701_v21 = vmax.f32 %v2107_v14, %v700_v0 }
 0x12c   : >> { %2861 = vst [vmem:[#allocation55_spill] sm:$0xff] %v2115_v53  ;;  %v596_v1 = vrot.slane %v595_v24, 1  ;;  %v692_v47 = vrot.slane %v691_v9, 1  ;;  %v741_v11 = vsel %vm740_vm4, %v1993_v18, %v1952_v42  ;;  %v760_v30 = vsel %vm740_vm4, %v1995_v2, %v1957_v43 }
 0x12d   : >> { %v601_v48 = vmax.f32 %v599_v12, %v600_v31  ;;  %v697_v38 = vmax.f32 %v695_v27, %v696_v22  ;;  %v606_v32 = vrot.slane %v605_v19, 2  ;;  %v702_v15 = vrot.slane %v701_v21, 2 }
 0x12e   : >> { %v2125_v5 = vmax.f32 %v595_v24, %v596_v1  ;;  %v2127_v41 = vmax.f32 %v691_v9, %v692_v47  ;;  %v743_v39 = vsel %vm742_vm5, %v2021_v59, %v741_v11  ;;  %v761_v7 = vsel %vm742_vm5, %v2023_v35, %v760_v30 }
 0x12f   : >> { %v607_v0 = vmax.f32 %v605_v19, %v606_v32  ;;  %v703_v42 = vmax.f32 %v701_v21, %v702_v15  ;;  %v602_v14 = vrot.slane %v601_v48, 1  ;;  %v698_v55 = vrot.slane %v697_v38, 1 }
 0x130   : >> { %2862 = vst [vmem:[#allocation56_spill] sm:$0xff] %v2127_v41  ;;  %v745_v43 = vsel %vm744_vm6, %v2057_v37, %v743_v39  ;;  %v762_v22 = vsel %vm744_vm6, %v2059_v57, %v761_v7  ;;  %v754_v47 = vsel %vm742_vm5, %v2031_v60, %v2007_v8  ;;  %v768_v12 = vsel %vm742_vm5, %v2033_v28, %v2011_v49 }
 0x131   : >> { %v608_v27 = vrot.slane %v607_v0, 1  ;;  %v704_v24 = vrot.slane %v703_v42, 1  ;;  %v2143_v19 = vmax.f32 %v601_v48, %v602_v14  ;;  %v2145_v21 = vmax.f32 %v697_v38, %v698_v55 }
 0x132   : >> { %v747_v9 = vsel %vm746_vm7, %v2077_v3, %v745_v43  ;;  %v763_v31 = vsel %vm746_vm7, %v2079_v58, %v762_v22  ;;  %v755_v1 = vsel %vm744_vm6, %v2065_v26, %v754_v47  ;;  %v769_v8 = vsel %vm744_vm6, %v2067_v56, %v768_v12 }
 0x133   : >> { %2863 = vst [vmem:[#allocation57_spill] sm:$0xff] %v2145_v21  ;;  %v749_v49 = vsel %vm748_vm8, %v2113_v4, %v747_v9  ;;  %v764_v14 = vsel %vm748_vm8, %v2115_v53, %v763_v31  ;;  %v2159_v55 = vmax.f32 %v607_v0, %v608_v27  ;;  %v2161_v11 = vmax.f32 %v703_v42, %v704_v24 }
 0x134   : >> { %v751_v30 = vsel %vm750_vm9, %v2143_v19, %v749_v49  ;;  %v765_v48 = vsel %vm750_vm9, %v2145_v21, %v764_v14  ;;  %v756_v38 = vsel %vm746_vm7, %v2087_v52, %v755_v1  ;;  %v770_v32 = vsel %vm746_vm7, %v2089_v6, %v769_v8 }
 0x135   : >> { %2864 = vst [vmem:[#allocation58_spill] sm:$0xff] %v2161_v11  ;;  %v1573_v15 = vpack.i.bf16 %v765_v48, %v751_v30  ;;  %v757_v39 = vsel %vm748_vm8, %v2125_v5, %v756_v38  ;;  %v771_v7 = vsel %vm748_vm8, %v2127_v41, %v770_v32 }
 0x136   : >> { %v758_v0 = vsel %vm750_vm9, %v2159_v55, %v757_v39  ;;  %v772_v42 = vsel %vm750_vm9, %v2161_v11, %v771_v7 }
 0x137   : >> { %1574 = vrot.lane.b32.xlu0 %v1573_v15, %s1654_s27  ;;  %v1578_v43 = vpack.i.bf16 %v772_v42, %v758_v0 }
 0x13b   : >> { %1579 = vrot.lane.b32.xlu0 %v1578_v43, %s1654_s27 }
 0x1a9   : >> { %v1575_v22 = vpop.permute.xlu0 %1574 }
 0x1aa   : >> { %v1577_v12 = vunpack.i.h.bf16 %v1575_v22  ;;  %v1576_v27 = vunpack.i.l.bf16 %v1575_v22 }
 0x1ad   : >> { %v1580_v47 = vpop.permute.xlu0 %1579 }
 0x1ae   : >> { %v1582_v24 = vunpack.i.h.bf16 %v1580_v47  ;;  %v1581_v9 = vunpack.i.l.bf16 %v1580_v47 }
 0x1b0   : >> { %v786_v31 = vsel %vm785_vm10, %v1576_v27, %v1581_v9  ;;  %v2180_v1 = vsel %vm785_vm10, %v1577_v12, %v1582_v24  ;;  %v788_v8 = vsel %vm785_vm10, %v1581_v9, %v1576_v27  ;;  %v789_v49 = vsel %vm785_vm10, %v1582_v24, %v1577_v12 }
 0x1b1   : >> { %v794_v14 = vrot.slane %v788_v8, 1  ;;  %v795_v30 = vrot.slane %v786_v31, 1  ;;  %v796_v48 = vrot.slane %v788_v8, 2  ;;  %v797_v38 = vrot.slane %v786_v31, 2 }
 0x1b2   : >> { %v798_v32 = vrot.slane %v788_v8, 3  ;;  %v799_v15 = vrot.slane %v786_v31, 3  ;;  %v800_v39 = vrot.slane %v788_v8, 4  ;;  %v801_v7 = vrot.slane %v786_v31, 4 }
 0x1b3   : >> { %v802_v0 = vrot.slane %v788_v8, 5  ;;  %v803_v42 = vrot.slane %v786_v31, 5  ;;  %v804_v43 = vrot.slane %v788_v8, 6  ;;  %v805_v10 = vrot.slane %v786_v31, 6 }
 0x1b4   : >> { %v806_v22 = vrot.slane %v788_v8, 7  ;;  %v807_v61 = vrot.slane %v786_v31, 7  ;;  %v808_v47 = vrot.slane %v789_v49, 1  ;;  %v809_v40 = vrot.slane %v2180_v1, 1 }
 0x1b5   : >> { %v810_v23 = vrot.slane %v789_v49, 2  ;;  %v811_v12 = vrot.slane %v2180_v1, 2  ;;  %v812_v27 = vrot.slane %v789_v49, 3  ;;  %v813_v24 = vrot.slane %v2180_v1, 3 }
 0x1b6   : >> { %v814_v9 = vrot.slane %v789_v49, 4  ;;  %v815_v25 = vrot.slane %v2180_v1, 4  ;;  %v816_v13 = vrot.slane %v789_v49, 5  ;;  %v817_v17 = vrot.slane %v2180_v1, 5 }
 0x1b7   : >> { %v818_v54 = vrot.slane %v789_v49, 6  ;;  %v819_v16 = vrot.slane %v2180_v1, 6  ;;  %v820_v46 = vrot.slane %v789_v49, 7  ;;  %v821_v36 = vrot.slane %v2180_v1, 7 }
 0x1b8   : >> { %v2190_v11 = vmax.f32 %v1923_v50, %v788_v8  ;;  %v2193_v21 = vmax.f32 %v1927_v62, %v786_v31  ;;  %v2196_v41 = vmax.f32 %v1939_v33, %v794_v14  ;;  %v2199_v53 = vmax.f32 %v1959_v44, %v795_v30 }
 0x1b9   : >> { %v2202_v6 = vmax.f32 %v1993_v18, %v796_v48  ;;  %v2205_v58 = vmax.f32 %v1999_v20, %v797_v38  ;;  %v2208_v56 = vmax.f32 %v2021_v59, %v798_v32  ;;  %v2211_v50 = vmax.f32 %v2031_v60, %v799_v15 }
 0x1ba   : >> { %v2214_v62 = vmax.f32 %v2057_v37, %v800_v39  ;;  %v2217_v33 = vmax.f32 %v2065_v26, %v801_v7  ;;  %v2220_v44 = vmax.f32 %v2077_v3, %v802_v0  ;;  %v2223_v18 = vmax.f32 %v2087_v52, %v803_v42 }
 0x1bb   : >> { %v2226_v20 = vmax.f32 %v2113_v4, %v804_v43  ;;  %v2229_v59 = vmax.f32 %v2125_v5, %v805_v10  ;;  %v2232_v60 = vmax.f32 %v2143_v19, %v806_v22  ;;  %v2235_v37 = vmax.f32 %v2159_v55, %v807_v61 }
 0x1bc   : >> { %v2238_v26 = vmax.f32 %v1925_v51, %v789_v49  ;;  %v2242_v3 = vmax.f32 %v1929_v63, %v2180_v1  ;;  %v2245_v52 = vmax.f32 %v1941_v34, %v808_v47  ;;  %v2248_v4 = vmax.f32 %v1961_v45, %v809_v40  ;;  %v2866_v34 = vld [vmem:[#allocation44_spill] sm:$0xff]  ;;  %v2868_v40 = vld [vmem:[#allocation47_spill] sm:$0xff] }
 0x1bd   : >> { %v2251_v10 = vmax.f32 %v1995_v2, %v810_v23  ;;  %v2254_v5 = vmax.f32 %v2001_v29, %v811_v12  ;;  %v2257_v61 = vmax.f32 %v2023_v35, %v812_v27  ;;  %v2260_v51 = vmax.f32 %v2033_v28, %v813_v24  ;;  %v2870_v2 = vld [vmem:[#allocation50_spill] sm:$0xff]  ;;  %v2872_v29 = vld [vmem:[#allocation55_spill] sm:$0xff]  ;;  %v2874_v35 = vld [vmem:[#allocation56_spill] sm:$0xff] }
 0x1be   : >> { %v2263_v63 = vmax.f32 %v2059_v57, %v814_v9  ;;  %v2266_v19 = vmax.f32 %v2866_v34, %v815_v25  ;;  %v2269_v45 = vmax.f32 %v2868_v40, %v816_v13  ;;  %v2272_v23 = vmax.f32 %v2870_v2, %v817_v17  ;;  %v2876_v28 = vld [vmem:[#allocation57_spill] sm:$0xff]  ;;  %v2878_v57 = vld [vmem:[#allocation58_spill] sm:$0xff] }
 0x1bf   : >> { %v2275_v55 = vmax.f32 %v2872_v29, %v818_v54  ;;  %v2278_v31 = vmax.f32 %v2874_v35, %v819_v16  ;;  %v2281_v1 = vmax.f32 %v2876_v28, %v820_v46  ;;  %v2284_v8 = vmax.f32 %v2878_v57, %v821_v36 }
 0x1c0   : >> { %2867 = vst [vmem:[#allocation44_spill] sm:$0xff] %v2266_v19  ;;  %2869 = vst [vmem:[#allocation47_spill] sm:$0xff] %v2269_v45  ;;  %v918_v25 = vrot.slane %v2196_v41, 7  ;;  %v920_v13 = vrot.slane %v2202_v6, 6  ;;  %v922_v49 = vrot.slane %v2208_v56, 5  ;;  %v924_v17 = vrot.slane %v2214_v62, 4 }
 0x1c1   : >> { %2871 = vst [vmem:[#allocation50_spill] sm:$0xff] %v2272_v23  ;;  %2873 = vst [vmem:[#allocation55_spill] sm:$0xff] %v2275_v55  ;;  %v926_v54 = vrot.slane %v2220_v44, 3  ;;  %v928_v14 = vrot.slane %v2226_v20, 2  ;;  %v930_v16 = vrot.slane %v2232_v60, 1  ;;  %v932_v46 = vrot.slane %v2199_v53, 7 }
 0x1c2   : >> { %2875 = vst [vmem:[#allocation56_spill] sm:$0xff] %v2278_v31  ;;  %2877 = vst [vmem:[#allocation57_spill] sm:$0xff] %v2281_v1  ;;  %v919_v36 = vsel %vm738_vm3, %v918_v25, %v2190_v11  ;;  %v934_v30 = vrot.slane %v2205_v58, 6  ;;  %v936_v48 = vrot.slane %v2211_v50, 5  ;;  %v938_v38 = vrot.slane %v2217_v33, 4 }
 0x1c3   : >> { %2879 = vst [vmem:[#allocation58_spill] sm:$0xff] %v2284_v8  ;;  %v921_v32 = vsel %vm740_vm4, %v920_v13, %v919_v36  ;;  %v933_v15 = vsel %vm738_vm3, %v932_v46, %v2193_v21  ;;  %v940_v39 = vrot.slane %v2223_v18, 3  ;;  %v942_v7 = vrot.slane %v2229_v59, 2 }
 0x1c4   : >> { %v923_v0 = vsel %vm742_vm5, %v922_v49, %v921_v32  ;;  %v935_v42 = vsel %vm740_vm4, %v934_v30, %v933_v15  ;;  %v944_v43 = vrot.slane %v2235_v37, 1  ;;  %v946_v22 = vrot.slane %v2245_v52, 7 }
 0x1c5   : >> { %v925_v47 = vsel %vm744_vm6, %v924_v17, %v923_v0  ;;  %v937_v12 = vsel %vm742_vm5, %v936_v48, %v935_v42  ;;  %v948_v27 = vrot.slane %v2251_v10, 6  ;;  %v950_v24 = vrot.slane %v2257_v61, 5 }
 0x1c6   : >> { %v927_v9 = vsel %vm746_vm7, %v926_v54, %v925_v47  ;;  %v939_v34 = vsel %vm744_vm6, %v938_v38, %v937_v12  ;;  %v947_v40 = vsel %vm738_vm3, %v946_v22, %v2238_v26  ;;  %v952_v2 = vrot.slane %v2263_v63, 4 }
 0x1c7   : >> { %v929_v29 = vsel %vm748_vm8, %v928_v14, %v927_v9  ;;  %v941_v35 = vsel %vm746_vm7, %v940_v39, %v939_v34  ;;  %v949_v28 = vsel %vm740_vm4, %v948_v27, %v947_v40  ;;  %v954_v57 = vrot.slane %v2269_v45, 3 }
 0x1c8   : >> { %v2322_v25 = vsel %vm750_vm9, %v930_v16, %v929_v29  ;;  %v943_v13 = vsel %vm748_vm8, %v942_v7, %v941_v35  ;;  %v951_v49 = vsel %vm742_vm5, %v950_v24, %v949_v28  ;;  %v956_v17 = vrot.slane %v2275_v55, 2 }
 0x1c9   : >> { %v2328_v54 = vsel %vm750_vm9, %v944_v43, %v943_v13  ;;  %v953_v14 = vsel %vm744_vm6, %v952_v2, %v951_v49  ;;  %v958_v46 = vrot.slane %v2281_v1, 1  ;;  %v960_v36 = vrot.slane %v2248_v4, 7 }
 0x1ca   : >> { %v955_v30 = vsel %vm746_vm7, %v954_v57, %v953_v14  ;;  %v962_v16 = vrot.slane %v2254_v5, 6  ;;  %v964_v48 = vrot.slane %v2260_v51, 5  ;;  %v966_v38 = vrot.slane %v2266_v19, 4 }
 0x1cb   : >> { %v957_v32 = vsel %vm748_vm8, %v956_v17, %v955_v30  ;;  %v961_v15 = vsel %vm738_vm3, %v960_v36, %v2242_v3  ;;  %v968_v39 = vrot.slane %v2272_v23, 3  ;;  %v970_v7 = vrot.slane %v2278_v31, 2 }
 0x1cc   : >> { %v2343_v0 = vsel %vm750_vm9, %v958_v46, %v957_v32  ;;  %v963_v42 = vsel %vm740_vm4, %v962_v16, %v961_v15  ;;  %v972_v43 = vrot.slane %v2284_v8, 1  ;;  %v974_v22 = vrot.slane %v2328_v54, 1 }
 0x1cd   : >> { %v965_v47 = vsel %vm742_vm5, %v964_v48, %v963_v42  ;;  %v975_v12 = vrot.slane %v2322_v25, 1  ;;  %v976_v27 = vrot.slane %v2328_v54, 2  ;;  %v977_v24 = vrot.slane %v2322_v25, 2 }
 0x1ce   : >> { %v967_v9 = vsel %vm744_vm6, %v966_v38, %v965_v47  ;;  %v978_v34 = vrot.slane %v2328_v54, 3  ;;  %v979_v40 = vrot.slane %v2322_v25, 3  ;;  %v980_v2 = vrot.slane %v2328_v54, 4 }
 0x1cf   : >> { %v969_v29 = vsel %vm746_vm7, %v968_v39, %v967_v9  ;;  %v981_v35 = vrot.slane %v2322_v25, 4  ;;  %v982_v28 = vrot.slane %v2328_v54, 5  ;;  %v983_v57 = vrot.slane %v2322_v25, 5 }
 0x1d0   : >> { %v971_v13 = vsel %vm748_vm8, %v970_v7, %v969_v29  ;;  %v984_v49 = vrot.slane %v2328_v54, 6  ;;  %v985_v17 = vrot.slane %v2322_v25, 6  ;;  %v986_v14 = vrot.slane %v2328_v54, 7 }
 0x1d1   : >> { %v2365_v46 = vsel %vm750_vm9, %v972_v43, %v971_v13  ;;  %v987_v36 = vrot.slane %v2322_v25, 7  ;;  %v989_v30 = vrot.slane %v2343_v0, 1  ;;  %v991_v16 = vrot.slane %v2343_v0, 2 }
 0x1d2   : >> { %v988_v48 = vrot.slane %v2365_v46, 1  ;;  %v990_v38 = vrot.slane %v2365_v46, 2  ;;  %v992_v32 = vrot.slane %v2365_v46, 3  ;;  %v993_v15 = vrot.slane %v2343_v0, 3 }
 0x1d3   : >> { %v994_v39 = vrot.slane %v2365_v46, 4  ;;  %v995_v7 = vrot.slane %v2343_v0, 4  ;;  %v996_v42 = vrot.slane %v2365_v46, 5  ;;  %v997_v43 = vrot.slane %v2343_v0, 5 }
 0x1d4   : >> { %v998_v47 = vrot.slane %v2365_v46, 6  ;;  %v999_v9 = vrot.slane %v2343_v0, 6  ;;  %v1000_v29 = vrot.slane %v2365_v46, 7  ;;  %v1001_v13 = vrot.slane %v2343_v0, 7 }
 0x1d5   : >> { %v1034_v8 = vmax.f32 %v2190_v11, %v2328_v54  ;;  %v1035_v1 = vmax.f32 %v2193_v21, %v2322_v25  ;;  %v2387_v31 = vmax.f32 %v2196_v41, %v974_v22  ;;  %v2390_v55 = vmax.f32 %v2199_v53, %v975_v12 }
 0x1d6   : >> { %v2393_v23 = vmax.f32 %v2202_v6, %v976_v27  ;;  %v2396_v45 = vmax.f32 %v2205_v58, %v977_v24  ;;  %v2399_v19 = vmax.f32 %v2208_v56, %v978_v34  ;;  %v2402_v11 = vmax.f32 %v2211_v50, %v979_v40  ;;  %v2887_v34 = vld [vmem:[#allocation19_spill] sm:$0xff] }
 0x1d7   : >> { %v2405_v21 = vmax.f32 %v2214_v62, %v980_v2  ;;  %v2408_v41 = vmax.f32 %v2217_v33, %v981_v35  ;;  %v2411_v53 = vmax.f32 %v2220_v44, %v982_v28  ;;  %v2414_v6 = vmax.f32 %v2223_v18, %v983_v57 }
 0x1d8   : >> { %v2417_v58 = vmax.f32 %v2226_v20, %v984_v49  ;;  %v2420_v56 = vmax.f32 %v2229_v59, %v985_v17  ;;  %v2423_v50 = vmax.f32 %v2232_v60, %v986_v14  ;;  %v2426_v62 = vmax.f32 %v2235_v37, %v987_v36 }
 0x1d9   : >> { %v1050_v33 = vmax.f32 %v2238_v26, %v2365_v46  ;;  %v1051_v44 = vmax.f32 %v2242_v3, %v2343_v0  ;;  %v2433_v18 = vmax.f32 %v2245_v52, %v988_v48  ;;  %v2436_v20 = vmax.f32 %v2248_v4, %v989_v30  ;;  %v2880_v52 = vld [vmem:[#allocation44_spill] sm:$0xff]  ;;  %v2881_v4 = vld [vmem:[#allocation47_spill] sm:$0xff] }
 0x1da   : >> { %v2439_v59 = vmax.f32 %v2251_v10, %v990_v38  ;;  %v2442_v60 = vmax.f32 %v2254_v5, %v991_v16  ;;  %v2445_v37 = vmax.f32 %v2257_v61, %v992_v32  ;;  %v2448_v26 = vmax.f32 %v2260_v51, %v993_v15  ;;  %v2882_v10 = vld [vmem:[#allocation50_spill] sm:$0xff]  ;;  %v2883_v5 = vld [vmem:[#allocation55_spill] sm:$0xff]  ;;  %v2884_v61 = vld [vmem:[#allocation56_spill] sm:$0xff] }
 0x1db   : >> { %v2451_v3 = vmax.f32 %v2263_v63, %v994_v39  ;;  %v2454_v25 = vmax.f32 %v2880_v52, %v995_v7  ;;  %v2457_v54 = vmax.f32 %v2881_v4, %v996_v42  ;;  %v2460_v0 = vmax.f32 %v2882_v10, %v997_v43  ;;  %v2885_v51 = vld [vmem:[#allocation57_spill] sm:$0xff]  ;;  %v2886_v63 = vld [vmem:[#allocation58_spill] sm:$0xff] }
 0x1dc   : >> { %v2463_v22 = vmax.f32 %v2883_v5, %v998_v47  ;;  %v2466_v12 = vmax.f32 %v2884_v61, %v999_v9  ;;  %v2469_v27 = vmax.f32 %v2885_v51, %v1000_v29  ;;  %v2472_v24 = vmax.f32 %v2886_v63, %v1001_v13 }
 0x1dd   : >> { %v2475_v40 = vrot.slane %v1034_v8, %v2887_v34  ;;  %v2478_v2 = vrot.slane %v1035_v1, %v2887_v34  ;;  %v1081_v35 = vrot.slane %v2387_v31, %v2887_v34  ;;  %v1085_v28 = vrot.slane %v2390_v55, %v2887_v34 }
 0x1de   : >> { %v1089_v57 = vrot.slane %v2393_v23, %v2887_v34  ;;  %v1093_v49 = vrot.slane %v2396_v45, %v2887_v34  ;;  %v1097_v17 = vrot.slane %v2399_v19, %v2887_v34  ;;  %v1101_v8 = vrot.slane %v2402_v11, %v2887_v34 }
 0x1df   : >> { %v1105_v1 = vrot.slane %v2405_v21, %v2887_v34  ;;  %v1109_v31 = vrot.slane %v2408_v41, %v2887_v34  ;;  %v1113_v55 = vrot.slane %v2411_v53, %v2887_v34  ;;  %v1117_v23 = vrot.slane %v2414_v6, %v2887_v34  ;;  %v2888_v21 = vld [vmem:[#allocation20_spill] sm:$0xff]  ;;  %v2890_v6 = vld [vmem:[#allocation22_spill] sm:$0xff] }
 0x1e0   : >> { %v1121_v45 = vrot.slane %v2417_v58, %v2887_v34  ;;  %v1125_v19 = vrot.slane %v2420_v56, %v2887_v34  ;;  %v1129_v14 = vrot.slane %v2423_v50, %v2887_v34  ;;  %v1133_v46 = vrot.slane %v2426_v62, %v2887_v34  ;;  %v2892_v50 = vld [vmem:[#allocation24_spill] sm:$0xff] }
 0x1e1   : >> { %v1137_v36 = vrot.slane %v1050_v33, %v2887_v34  ;;  %v1141_v30 = vrot.slane %v1051_v44, %v2887_v34  ;;  %v1145_v16 = vrot.slane %v2433_v18, %v2887_v34  ;;  %v1149_v48 = vrot.slane %v2436_v20, %v2887_v34  ;;  %v2893_v33 = vld [vmem:[#allocation26_spill] sm:$0xff]  ;;  %v2894_v18 = vld [vmem:[#allocation28_spill] sm:$0xff] }
 0x1e2   : >> { %v1153_v38 = vrot.slane %v2439_v59, %v2887_v34  ;;  %v1157_v32 = vrot.slane %v2442_v60, %v2887_v34  ;;  %v1161_v15 = vrot.slane %v2445_v37, %v2887_v34  ;;  %v1165_v39 = vrot.slane %v2448_v26, %v2887_v34  ;;  %v2895_v59 = vld [vmem:[#allocation30_spill] sm:$0xff]  ;;  %v2896_v37 = vld [vmem:[#allocation32_spill] sm:$0xff] }
 0x1e3   : >> { %v1169_v7 = vrot.slane %v2451_v3, %v2887_v34  ;;  %v1173_v42 = vrot.slane %v2454_v25, %v2887_v34  ;;  %v1177_v43 = vrot.slane %v2457_v54, %v2887_v34  ;;  %v1181_v47 = vrot.slane %v2460_v0, %v2887_v34  ;;  %v2897_v3 = vld [vmem:[#allocation34_spill] sm:$0xff]  ;;  %v2898_v25 = vld [vmem:[#allocation36_spill] sm:$0xff] }
 0x1e4   : >> { %v1185_v9 = vrot.slane %v2463_v22, %v2887_v34  ;;  %v1189_v29 = vrot.slane %v2466_v12, %v2887_v34  ;;  %v1193_v13 = vrot.slane %v2469_v27, %v2887_v34  ;;  %v1197_v11 = vrot.slane %v2472_v24, %v2887_v34  ;;  %v2899_v54 = vld [vmem:[#allocation38_spill] sm:$0xff]  ;;  %v2900_v0 = vld [vmem:[#allocation40_spill] sm:$0xff]  ;;  %v2902_v12 = vld [vmem:[#allocation45_spill] sm:$0xff] }
 0x1e5   : >> { %v1198_v53 = vsel %vm1801_vm0, %v2475_v40, %v2888_v21  ;;  %v1199_v56 = vsel %vm1805_vm1, %v2478_v2, %v2890_v6  ;;  %v1200_v62 = vsel %vm1801_vm0, %v1081_v35, %v2892_v50  ;;  %v1201_v44 = vsel %vm1805_vm1, %v1085_v28, %v2893_v33  ;;  %v2901_v22 = vld [vmem:[#allocation42_spill] sm:$0xff]  ;;  %v2903_v27 = vld [vmem:[#allocation48_spill] sm:$0xff]  ;;  %v2904_v24 = vld [vmem:[#allocation51_spill] sm:$0xff] }
 0x1e6   : >> { %v1202_v20 = vsel %vm1801_vm0, %v1089_v57, %v2894_v18  ;;  %v1203_v60 = vsel %vm1805_vm1, %v1093_v49, %v2895_v59  ;;  %v1204_v26 = vsel %vm1801_vm0, %v1097_v17, %v2896_v37  ;;  %v1205_v52 = vsel %vm1805_vm1, %v1101_v8, %v2897_v3  ;;  %v2905_v40 = vld [vmem:[#allocation53_spill] sm:$0xff]  ;;  %v2907_v57 = vld [vmem:[#allocation23_spill] sm:$0xff]  ;;  %v2920_v18 = vld [vmem:[#allocation52_spill] sm:$0xff] }
 0x1e7   : >> { %v1206_v4 = vsel %vm1801_vm0, %v1105_v1, %v2898_v25  ;;  %v1207_v10 = vsel %vm1805_vm1, %v1109_v31, %v2899_v54  ;;  %v1208_v5 = vsel %vm1801_vm0, %v1113_v55, %v2900_v0  ;;  %v1209_v61 = vsel %vm1805_vm1, %v1117_v23, %v2901_v22  ;;  %v2906_v35 = vld [vmem:[#allocation21_spill] sm:$0xff]  ;;  %v2909_v1 = vld [vmem:[#allocation27_spill] sm:$0xff]  ;;  %v2921_v59 = vld [vmem:[#allocation54_spill] sm:$0xff] }
 0x1e8   : >> { %v1210_v51 = vsel %vm1801_vm0, %v1121_v45, %v2902_v12  ;;  %v1211_v63 = vsel %vm1805_vm1, %v1125_v19, %v2903_v27  ;;  %v1212_v34 = vsel %vm1801_vm0, %v1129_v14, %v2904_v24  ;;  %v1213_v2 = vsel %vm1805_vm1, %v1133_v46, %v2905_v40  ;;  %v2908_v17 = vld [vmem:[#allocation25_spill] sm:$0xff]  ;;  %v2911_v45 = vld [vmem:[#allocation31_spill] sm:$0xff] }
 0x1e9   : >> { %v1214_v28 = vsel %vm1801_vm0, %v1137_v36, %v2906_v35  ;;  %v1215_v49 = vsel %vm1805_vm1, %v1141_v30, %v2907_v57  ;;  %v1216_v8 = vsel %vm1801_vm0, %v1145_v16, %v2908_v17  ;;  %v1217_v31 = vsel %vm1805_vm1, %v1149_v48, %v2909_v1  ;;  %v2910_v55 = vld [vmem:[#allocation29_spill] sm:$0xff]  ;;  %v2913_v36 = vld [vmem:[#allocation35_spill] sm:$0xff] }
 0x1ea   : >> { %v1218_v23 = vsel %vm1801_vm0, %v1153_v38, %v2910_v55  ;;  %v1219_v19 = vsel %vm1805_vm1, %v1157_v32, %v2911_v45  ;;  %v2912_v14 = vld [vmem:[#allocation33_spill] sm:$0xff]  ;;  %v1221_v30 = vsel %vm1805_vm1, %v1165_v39, %v2913_v36  ;;  %v2915_v21 = vld [vmem:[#allocation39_spill] sm:$0xff]  ;;  %v2918_v39 = vld [vmem:[#allocation46_spill] sm:$0xff]  ;;  %v1493_v37 = vpack.c.bf16 %v1199_v56, %v1198_v53 }
 0x1eb   : >> { %v1220_v46 = vsel %vm1801_vm0, %v1161_v15, %v2912_v14  ;;  %v2914_v16 = vld [vmem:[#allocation37_spill] sm:$0xff]  ;;  %v1223_v38 = vsel %vm1805_vm1, %v1173_v42, %v2915_v21  ;;  %v2917_v50 = vld [vmem:[#allocation43_spill] sm:$0xff]  ;;  %v1494_v3 = vpack.c.bf16 %v1201_v44, %v1200_v62  ;;  %v1495_v25 = vpack.c.bf16 %v1203_v60, %v1202_v20 }
 0x1ec   : >> { %v1222_v48 = vsel %vm1801_vm0, %v1169_v7, %v2914_v16  ;;  %v2916_v6 = vld [vmem:[#allocation41_spill] sm:$0xff]  ;;  %v1225_v15 = vsel %vm1805_vm1, %v1181_v47, %v2917_v50  ;;  %v1226_v7 = vsel %vm1801_vm0, %v1185_v9, %v2918_v39  ;;  %v1229_v47 = vsel %vm1805_vm1, %v1197_v11, %v2921_v59  ;;  %1331 = vst [vmem:[%s2628_s28] sm:$0xff] %v1493_v37 }
 0x1ed   : >> { %v1224_v32 = vsel %vm1801_vm0, %v1177_v43, %v2916_v6  ;;  %v2919_v33 = vld [vmem:[#allocation49_spill] sm:$0xff]  ;;  %v1228_v43 = vsel %vm1801_vm0, %v1193_v13, %v2920_v18  ;;  %v1496_v9 = vpack.c.bf16 %v1205_v52, %v1204_v26  ;;  %v1497_v54 = vpack.c.bf16 %v1207_v10, %v1206_v4  ;;  %1332 = vst [vmem:[%s2628_s28 + $0x8] sm:$0xff] %v1494_v3 }
 0x1ee   : >> { %v1227_v42 = vsel %vm1805_vm1, %v1189_v29, %v2919_v33  ;;  %v1498_v0 = vpack.c.bf16 %v1209_v61, %v1208_v5  ;;  %v1499_v29 = vpack.c.bf16 %v1211_v63, %v1210_v51  ;;  %v1500_v22 = vpack.c.bf16 %v1213_v2, %v1212_v34  ;;  %1333 = vst [vmem:[%s2628_s28 + $0x10] sm:$0xff] %v1495_v25 }
 0x1ef   : >> { %v1501_v12 = vpack.c.bf16 %v1215_v49, %v1214_v28  ;;  %v1502_v13 = vpack.c.bf16 %v1217_v31, %v1216_v8  ;;  %v1503_v27 = vpack.c.bf16 %v1219_v19, %v1218_v23  ;;  %v1504_v11 = vpack.c.bf16 %v1221_v30, %v1220_v46  ;;  %1334 = vst [vmem:[%s2628_s28 + $0x18] sm:$0xff] %v1496_v9 }
 0x1f0   : >> { %v1505_v53 = vpack.c.bf16 %v1223_v38, %v1222_v48  ;;  %v1506_v56 = vpack.c.bf16 %v1225_v15, %v1224_v32  ;;  %v1507_v62 = vpack.c.bf16 %v1227_v42, %v1226_v7  ;;  %v1508_v44 = vpack.c.bf16 %v1229_v47, %v1228_v43  ;;  %1335 = vst [vmem:[%s2628_s28 + $0x20] sm:$0xff] %v1497_v54 }
 0x1f1   : >> { %1336 = vst [vmem:[%s2628_s28 + $0x28] sm:$0xff] %v1498_v0  ;;  %1337 = vst [vmem:[%s2628_s28 + $0x30] sm:$0xff] %v1499_v29 }
 0x1f2   : >> { %1338 = vst [vmem:[%s2628_s28 + $0x38] sm:$0xff] %v1500_v22  ;;  %1339 = vst [vmem:[%s2628_s28 + $0x40] sm:$0xff] %v1501_v12  ;;  %241 = sbr.rel (!%p239_p11) target bundleno = 30 (0x1e), region = 76 }
 0x1f3   : >> { %1340 = vst [vmem:[%s2628_s28 + $0x48] sm:$0xff] %v1502_v13  ;;  %1341 = vst [vmem:[%s2628_s28 + $0x50] sm:$0xff] %v1503_v27 }
 0x1f4   : >> { %1342 = vst [vmem:[%s2628_s28 + $0x58] sm:$0xff] %v1504_v11  ;;  %1343 = vst [vmem:[%s2628_s28 + $0x60] sm:$0xff] %v1505_v53 }
 0x1f5   : >> { %1344 = vst [vmem:[%s2628_s28 + $0x68] sm:$0xff] %v1506_v56  ;;  %1345 = vst [vmem:[%s2628_s28 + $0x70] sm:$0xff] %v1507_v62 }
 0x1f6   : >> { %1346 = vst [vmem:[%s2628_s28 + $0x78] sm:$0xff] %v1508_v44 }
 0x1f7   : > { %1354 = sbr.rel (!%p1716_p5) target bundleno = 535 (0x217), region = 43  ;;  %s1356_s30 = ssub.s32 (%p1716_p5), 100, %s1728_s25 }
 0x1f8   : > { %p1357_p12 = scmp.lt.s32.totalorder (%p1716_p5), %s1356_s30, 32 }
 0x1fc   : > { %s2927_s30 = smov (!%p1357_p12, %s1356_s30), 32 }
 0x1fd   : > { %s2668_s4 = sshll.u32 %s2927_s30, 7 }
 0x1fe   : > { %s1362_s6 = ssub.s32 4096, %s2668_s4 }
 0x1ff   : > { %1363 = vsyncadd %s2663_s29, %s1362_s6  ;;  %p1486_p13 = scmp.ne.s32.totalorder %s2668_s4, 0  ;;  %s1512_s24 = sshll.u32 %s1699_s16, 12 }
 0x200   : > { %s2677_s8 = scalar_lea.hbm %s2727_s3, %s1512_s24  ;;  %s1369_s25 = sshll.u32 %s176_s17, 4  ;;  %s2681_s25 = int_to_ptr.vmem [resolvable:$true] %s1369_s25 }
 0x201   : > { %s1583_s9 = scalar_lea.vmem %s2681_s25, %s2668_s4  ;;  %s1655_s10 = smov [#allocation2]  }
 0x202   : > { %p1584_p0 = scmp.ne.s32.totalorder %s2681_s25, %s1583_s9  ;;  %s1587_s11 = sshll.u32 %s1655_s10, 4  ;;  %s1588_s11 = int_to_ptr.vmem [resolvable:$false] %s1587_s11 }
 0x203   : > { %s1589_s16 = scalar_lea.vmem %s1588_s11, 8192  ;;  %p1590_p3 = scmp.lt.s32.totalorder %s2681_s25, %s1588_s11 }
 0x204   : > { %p1585_p1 = pnand %p1584_p0, %p1486_p13  ;;  %p1591_p4 = scmp.lt.s32.totalorder %s1589_s16, %s1583_s9 }
 0x206   : > { %p1586_p2 = pneg %p1585_p1  ;;  %p1592_p5 = por %p1591_p4, %p1590_p3 }
 0x208   : > { %p1593_p7 = pnand %p1592_p5, %p1586_p2 }
 0x20a   : > { %1596 = shalt.err (!%p1593_p7)
}
 0x20b   : > { %s1597_s5 = scalar_lea.hbm %s2677_s8, %s2668_s4  ;;  %s1601_s20 = scalar_lea.hbm %s2727_s3, 12800 }
 0x20c   : > { %p1598_p8 = scmp.ne.s32.totalorder %s2677_s8, %s1597_s5  ;;  %p1602_p11 = scmp.lt.s32.totalorder %s2677_s8, %s2727_s3 }
 0x20d   : > { %p1603_p12 = scmp.lt.s32.totalorder %s1601_s20, %s1597_s5 }
 0x20e   : > { %p1599_p9 = pnand %p1598_p8, %p1486_p13 }
 0x20f   : > { %p1604_p0 = por %p1603_p12, %p1602_p11 }
 0x210   : > { %p1600_p10 = pneg %p1599_p9 }
 0x212   : > { %p1605_p1 = pnand %p1604_p0, %p1600_p10 }
 0x214   : > { %1608 = shalt.err (!%p1605_p1)
}
 0x215   : > { %s1656_s28 = smov 128   ;;  %s1657_s30 = smov 8  }
 0x216   : > { %1375 = dma.vmem_to_hbm [thread:$0]  (%p1486_p13), %s2681_s25, %s2668_s4, %s2677_s8, %s2663_s29, %s1656_s28, %s1656_s28, %s1657_s30  }
 0x217 PF: > { %p1528_p2 = scmp.ge.s32.totalorder %s1647_s15, 2  ;;  %s1384_s6 = sand.u32 1, %s1635_s12  }
 0x218   : > { %s1385_s24 = scalar_lea.sflag [#allocation3], %s1384_s6 }
 0x219   : > { %p1525_p3 = pnand %p1528_p2, %p1720_p6 }
 0x21b   : > { %p1526_p4 = pneg %p1525_p3 }
 0x21d   : > { %1630 = dma.done.wait (%p1526_p4), %s1385_s24, 4096  }
 0x21e   : > { %1632 = vsyncadd (%p1526_p4), %s1385_s24, 4294963200  ;;  %p13_p5 = scmp.ge.s32.totalorder %s1703_s18, 6   ;;  %s2922_s12 = smov %s1639_s13 }
 0x21f   : > { %s2923_s13 = smov %s1643_s14  ;;  %s2924_s14 = smov %s1714_s21 }
 0x220   : > { %s2925_s15 = smov %s1703_s18  ;;  %15 = sbr.rel (!%p13_p5) target bundleno = 3 (0x3), region = 87 }
 0x225   :  { %1390 = vsyncpa [#allocation3], 1 }
 0x226   :  { %1392 = vsyncpa [#allocation3 + $0x1], 1 }

</bundles_post_ra>
